<compile_context>
chip_gen: v7x
topology: tpu7x:2x2x1
jax: 0.10.0
libtpu: 0.0.40
codegen_flags: <defaults>
</compile_context>

<pallas_src>
import functools

import jax
import jax.numpy as jnp
from jax.experimental import pallas as pl
from jax.experimental.pallas import tpu as pltpu


def _round_up(v: int, m: int) -> int:
    return (v + m - 1) // m * m


def _autoencoder_kernel(x_ref, we_ref, be_ref, wd_ref, bd_ref, o_ref):
    """Fused encoder->ReLU->decoder->sigmoid on one batch tile (all in VMEM).

    Matmuls run in the operand dtype (f32 or bf16) with f32 accumulation;
    bias add / ReLU / sigmoid are done in f32 (safe on v5e's non-bf16 VPU/EUP).
    """
    x = x_ref[...]                                            # (TB, Dp), native dtype
    # encoder: (TB, Dp) @ (Dp, C) -> f32 accum
    h = jnp.dot(x, we_ref[...], preferred_element_type=jnp.float32)
    h = jnp.maximum(h + be_ref[...].astype(jnp.float32), 0.0)  # bias + ReLU in f32
    # decoder: (TB, C) @ (C, Dp) -> f32 accum (cast h to match weight dtype for MXU)
    y = jnp.dot(h.astype(wd_ref.dtype), wd_ref[...],
                preferred_element_type=jnp.float32)
    y = y + bd_ref[...].astype(jnp.float32)
    o_ref[...] = jax.nn.sigmoid(y).astype(o_ref.dtype)         # sigmoid in f32, cast out


@functools.partial(jax.jit, static_argnames=("block_b",))
def autoencoder_forward(x, w_enc_t, b_enc, w_dec_t, b_dec, *, block_b=512):
    """x: (B, D).  Returns (B, D) in x.dtype.

    block_b: requested batch-tile rows (rounded to a multiple of 8, clipped to B).
    Feature dim is padded to a multiple of 128 internally for lane-dense I/O.
    """
    B, D = x.shape
    C = w_enc_t.shape[1]
    assert w_enc_t.shape == (D, C)
    assert w_dec_t.shape == (C, D)

    # ---- tile / padding geometry -------------------------------------------
    D_pad = _round_up(D, 128)                      # 784 -> 896 (7*128): lane-dense
    blk = _round_up(min(block_b, max(B, 1)), 8)    # multiple of 8 sublanes (f32)
    B_pad = _round_up(B, blk)                      # no ragged last tile

    # ---- pad operands (zeros are mathematically inert on the encoder path) --
    if B_pad != B or D_pad != D:
        x_p = jnp.pad(x, ((0, B_pad - B), (0, D_pad - D)))
    else:
        x_p = x
    if D_pad != D:
        w_enc_p = jnp.pad(w_enc_t, ((0, D_pad - D), (0, 0)))   # extra rows = 0
        w_dec_p = jnp.pad(w_dec_t, ((0, 0), (0, D_pad - D)))   # extra cols = 0
        b_dec_p = jnp.pad(b_dec, (0, D_pad - D))               # padded outs -> 0.5, sliced off
    else:
        w_enc_p, w_dec_p, b_dec_p = w_enc_t, w_dec_t, b_dec

    b_enc2 = b_enc.astype(jnp.float32).reshape(1, C)
    b_dec2 = b_dec_p.astype(jnp.float32).reshape(1, D_pad)

    grid = (B_pad // blk,)
    itemsize = jnp.dtype(x.dtype).itemsize
    cost = pl.CostEstimate(
        flops=4 * B_pad * D_pad * C,
        transcendentals=B_pad * D_pad,
        bytes_accessed=(2 * B_pad * D_pad + 2 * D_pad * C) * itemsize
        + (C + D_pad) * 4,
    )

    out_p = pl.pallas_call(
        _autoencoder_kernel,
        out_shape=jax.ShapeDtypeStruct((B_pad, D_pad), x.dtype),
        grid_spec=pltpu.PrefetchScalarGridSpec(
            num_scalar_prefetch=0,
            grid=grid,
            in_specs=[
                pl.BlockSpec((blk, D_pad), lambda i: (i, 0)),   # x tile
                pl.BlockSpec((D_pad, C), lambda i: (0, 0)),     # encoder weight (resident)
                pl.BlockSpec((1, C), lambda i: (0, 0)),         # encoder bias
                pl.BlockSpec((C, D_pad), lambda i: (0, 0)),     # decoder weight (resident)
                pl.BlockSpec((1, D_pad), lambda i: (0, 0)),     # decoder bias
            ],
            out_specs=pl.BlockSpec((blk, D_pad), lambda i: (i, 0)),
        ),
        compiler_params=pltpu.CompilerParams(
            dimension_semantics=("parallel",),                  # shards across TCs on v7x
            vmem_limit_bytes=64 * 1024 * 1024,
        ),
        cost_estimate=cost,
    )(x_p, w_enc_p, b_enc2, w_dec_p, b_dec2)

    return out_p[:B, :D]


def init_params(key, outer_chans=784, central_chans=16):
    """Deterministic init mimicking nn.Linear's U(-1/sqrt(fan_in), 1/sqrt(fan_in))."""
    k1, k2, k3, k4 = jax.random.split(key, 4)
    lim_e = 1.0 / jnp.sqrt(outer_chans)
    lim_d = 1.0 / jnp.sqrt(central_chans)
    # Stored pre-transposed so the kernel does x @ W_t  (== x @ W.T in PyTorch terms).
    w_enc_t = jax.random.uniform(k1, (outer_chans, central_chans),
                                 minval=-lim_e, maxval=lim_e, dtype=jnp.float32)
    b_enc = jax.random.uniform(k2, (central_chans,),
                               minval=-lim_e, maxval=lim_e, dtype=jnp.float32)
    w_dec_t = jax.random.uniform(k3, (central_chans, outer_chans),
                                 minval=-lim_d, maxval=lim_d, dtype=jnp.float32)
    b_dec = jax.random.uniform(k4, (outer_chans,),
                               minval=-lim_d, maxval=lim_d, dtype=jnp.float32)
    return w_enc_t, b_enc, w_dec_t, b_dec


def reference_forward(x, w_enc_t, b_enc, w_dec_t, b_dec):
    h = jnp.maximum(x @ w_enc_t + b_enc, 0.0)
    return jax.nn.sigmoid(h @ w_dec_t + b_dec)


if __name__ == "__main__":
    OUTER = 784      # flattened 28x28 MNIST image
    CENTRAL = 16
    BATCH = 8        # small demo batch; kernel tiles up to block_b rows per step

    key = jax.random.PRNGKey(0)
    kx, kp = jax.random.split(key)
    x = jax.random.uniform(kx, (BATCH, OUTER), dtype=jnp.float32)  # pixel-like inputs
    params = init_params(kp, OUTER, CENTRAL)
    ref = reference_forward(x, *params)

    # --- f32 path (bit-accurate vs reference) -------------------------------
    out = jax.block_until_ready(autoencoder_forward(x, *params))
    assert out.shape == (BATCH, OUTER)
    assert jnp.allclose(out, ref, atol=1e-5, rtol=1e-5), "f32 mismatch vs JAX reference"

    # --- bf16 I/O path (halves HBM traffic; f32 accumulation inside) --------
    x_bf = x.astype(jnp.bfloat16)
    params_bf = (params[0].astype(jnp.bfloat16), params[1],
                 params[2].astype(jnp.bfloat16), params[3])
    out_bf = jax.block_until_ready(autoencoder_forward(x_bf, *params_bf))
    assert out_bf.shape == (BATCH, OUTER)
    assert jnp.allclose(out_bf.astype(jnp.float32), ref, atol=3e-2, rtol=3e-2), \
        "bf16 mismatch vs JAX reference"

    # TODO(synk): nn.MSELoss criterion is a training-time loss, not part of forward().
    print("KERNEL_OK")
</pallas_src>

<mosaic_0001>
module attributes {stable_mosaic.version = 11 : i64} {
  func.func @_autoencoder_kernel(%arg0: i32, %arg1: memref<8x896xf32, #tpu.memory_space<vmem>>, %arg2: memref<896x16xf32, #tpu.memory_space<vmem>>, %arg3: memref<1x16xf32, #tpu.memory_space<vmem>>, %arg4: memref<16x896xf32, #tpu.memory_space<vmem>>, %arg5: memref<1x896xf32, #tpu.memory_space<vmem>>, %arg6: memref<8x896xf32, #tpu.memory_space<vmem>>) attributes {dimension_semantics = [#tpu.dimension_semantics<parallel>], iteration_bounds = array<i64: 1>, scalar_prefetch = 0 : i64, scratch_operands = 0 : i64, tpu.core_type = #tpu.core_type<tc>, window_params = [{transform_indices = @transform_0, window_bounds = array<i64: 8, 896>}, {pipeline_mode = #tpu.pipeline_mode<synchronous>, transform_indices = @transform_1, window_bounds = array<i64: 896, 16>}, {pipeline_mode = #tpu.pipeline_mode<synchronous>, transform_indices = @transform_2, window_bounds = array<i64: 1, 16>}, {pipeline_mode = #tpu.pipeline_mode<synchronous>, transform_indices = @transform_3, window_bounds = array<i64: 16, 896>}, {pipeline_mode = #tpu.pipeline_mode<synchronous>, transform_indices = @transform_4, window_bounds = array<i64: 1, 896>}, {transform_indices = @transform_5, window_bounds = array<i64: 8, 896>}]} {
    %c0 = arith.constant 0 : index
    %c0_0 = arith.constant 0 : index
    %0 = vector.load %arg1[%c0, %c0_0] : memref<8x896xf32, #tpu.memory_space<vmem>>, vector<8x896xf32>
    %c0_1 = arith.constant 0 : index
    %c0_2 = arith.constant 0 : index
    %1 = vector.load %arg2[%c0_1, %c0_2] : memref<896x16xf32, #tpu.memory_space<vmem>>, vector<896x16xf32>
    %cst = arith.constant dense<0.000000e+00> : vector<8x16xf32>
    %2 = tpu.matmul %0, %1, %cst {dimension_numbers = #tpu.dot_dimension_numbers<[1], [0], [0], [1], [0, 0, 1, 1], [], []>} : vector<8x896xf32>, vector<896x16xf32>, vector<8x16xf32> -> vector<8x16xf32>
    %c0_3 = arith.constant 0 : index
    %c0_4 = arith.constant 0 : index
    %3 = vector.load %arg3[%c0_3, %c0_4] : memref<1x16xf32, #tpu.memory_space<vmem>>, vector<1x16xf32>
    %4 = vector.broadcast %3 : vector<1x16xf32> to vector<8x16xf32>
    %5 = arith.addf %2, %4 : vector<8x16xf32>
    %cst_5 = arith.constant 0.000000e+00 : f32
    %6 = vector.broadcast %cst_5 : f32 to vector<8x16xf32>
    %7 = arith.maximumf %5, %6 : vector<8x16xf32>
    %c0_6 = arith.constant 0 : index
    %c0_7 = arith.constant 0 : index
    %8 = vector.load %arg4[%c0_6, %c0_7] : memref<16x896xf32, #tpu.memory_space<vmem>>, vector<16x896xf32>
    %cst_8 = arith.constant dense<0.000000e+00> : vector<8x896xf32>
    %9 = tpu.matmul %7, %8, %cst_8 {dimension_numbers = #tpu.dot_dimension_numbers<[1], [0], [0], [1], [0, 0, 1, 1], [], []>} : vector<8x16xf32>, vector<16x896xf32>, vector<8x896xf32> -> vector<8x896xf32>
    %c0_9 = arith.constant 0 : index
    %c0_10 = arith.constant 0 : index
    %10 = vector.load %arg5[%c0_9, %c0_10] : memref<1x896xf32, #tpu.memory_space<vmem>>, vector<1x896xf32>
    %11 = vector.broadcast %10 : vector<1x896xf32> to vector<8x896xf32>
    %12 = arith.addf %9, %11 : vector<8x896xf32>
    %13 = arith.negf %12 : vector<8x896xf32>
    %14 = math.exp %13 : vector<8x896xf32>
    %cst_11 = arith.constant 1.000000e+00 : f32
    %15 = vector.broadcast %cst_11 : f32 to vector<8x896xf32>
    %16 = arith.addf %15, %14 : vector<8x896xf32>
    %17 = arith.divf %15, %16 : vector<8x896xf32>
    %c0_12 = arith.constant 0 : index
    %c0_13 = arith.constant 0 : index
    %18 = vector.load %arg6[%c0_12, %c0_13] : memref<8x896xf32, #tpu.memory_space<vmem>>, vector<8x896xf32>
    tpu.vector_store %arg6[%c0_12, %c0_13], %17 {strides = array<i32>} : memref<8x896xf32, #tpu.memory_space<vmem>>, vector<8x896xf32>,
    return
  }
  func.func @transform_0(%arg0: i32) -> (i32, i32) {
    %c0_i32 = arith.constant 0 : i32
    %c0_i32_0 = arith.constant 0 : i32
    return %arg0, %c0_i32 : i32, i32
  }
  func.func @transform_1(%arg0: i32) -> (i32, i32) {
    %c0_i32 = arith.constant 0 : i32
    %c0_i32_0 = arith.constant 0 : i32
    %c0_i32_1 = arith.constant 0 : i32
    return %c0_i32, %c0_i32_0 : i32, i32
  }
  func.func @transform_2(%arg0: i32) -> (i32, i32) {
    %c0_i32 = arith.constant 0 : i32
    %c0_i32_0 = arith.constant 0 : i32
    %c0_i32_1 = arith.constant 0 : i32
    return %c0_i32, %c0_i32_0 : i32, i32
  }
  func.func @transform_3(%arg0: i32) -> (i32, i32) {
    %c0_i32 = arith.constant 0 : i32
    %c0_i32_0 = arith.constant 0 : i32
    %c0_i32_1 = arith.constant 0 : i32
    return %c0_i32, %c0_i32_0 : i32, i32
  }
  func.func @transform_4(%arg0: i32) -> (i32, i32) {
    %c0_i32 = arith.constant 0 : i32
    %c0_i32_0 = arith.constant 0 : i32
    %c0_i32_1 = arith.constant 0 : i32
    return %c0_i32, %c0_i32_0 : i32, i32
  }
  func.func @transform_5(%arg0: i32) -> (i32, i32) {
    %c0_i32 = arith.constant 0 : i32
    %c0_i32_0 = arith.constant 0 : i32
    return %arg0, %c0_i32 : i32, i32
  }
}

</mosaic_0001>

<bundles_post_ra>
// kernel: autoencoder_forward.1
= control target key start
LH: loop header
LB: loop body
LE: loop exit
PB: predicated region body
PF: predicated region fallthrough
CT: control target
= control target key end

     0   :  { %10 = vsyncpa [#allocation3], 0  ;;  %s1520_s0 = inlined_call_operand.hbm [shape: f32[8,896], index: 0, kind: input, shape index: {}]   ;;  %s1521_s1 = inlined_call_operand.hbm [shape: f32[896,16], index: 1, kind: input, shape index: {}]   ;;  %s1522_s2 = inlined_call_operand.hbm [shape: f32[1,16], index: 2, kind: input, shape index: {}]   ;;  %s1523_s3 = inlined_call_operand.hbm [shape: f32[16,896], index: 3, kind: input, shape index: {}]   ;;  %s1524_s4 = inlined_call_operand.hbm [shape: f32[1,896], index: 4, kind: input, shape index: {}]   ;;  %s1525_s5 = inlined_call_operand.hbm [shape: f32[8,896], index: 5, kind: output, shape index: {}]  }
   0x1   :  { %11 = vsyncpa [#allocation6], 0 }
   0x2   :  { %12 = vsyncpa [#allocation9], 0 }
   0x3   :  { %13 = vsyncpa [#allocation4], 0  ;;  %s1389_s18 = smov [#allocation5]   ;;  %s1249_s22 = scalar_lea.hbm %s1521_s1, 14336 }
   0x4   :  { %s29_s19 = sshll.u32 %s1389_s18, 4  ;;  %p1250_p0 = scmp.ne.s32.totalorder %s1521_s1, %s1249_s22  ;;  %s30_s19 = int_to_ptr.vmem [resolvable:$true] %s29_s19 }
   0x5   :  { %p1253_p1 = scmp.lt.u32.totalorder %s1249_s22, %s1521_s1 }
   0x7   :  { %p1255_p2 = pnand %p1253_p1, %p1250_p0 }
   0x9   :  { %1258 = shalt.err (!%p1255_p2)
}
   0xa   :  { %s1259_s27 = scalar_lea.vmem %s30_s19, 14336  ;;  %p1264_p4 = scmp.lt.s32.totalorder %s30_s19, %s30_s19 }
   0xb   :  { %p1260_p3 = scmp.ne.s32.totalorder %s30_s19, %s1259_s27  ;;  %p1265_p5 = scmp.lt.s32.totalorder %s1259_s27, %s1259_s27 }
   0xd   :  { %p1266_p6 = por %p1265_p5, %p1264_p4 }
   0xf   :  { %p1267_p7 = pnand %p1266_p6, %p1260_p3 }
  0x11   :  { %1270 = shalt.err (!%p1267_p7)
}
  0x12   :  { %s1390_s28 = smov 128   ;;  %s1391_s29 = smov 8  }
  0x13   :  { %35 = dma.hbm_to_vmem [thread:$0]  %s1521_s1, 14336, %s30_s19, [#allocation6], %s1390_s28, %s1390_s28, %s1391_s29  }
  0x14   :  { %s1392_s7 = smov [#allocation8]   ;;  %s1271_s11 = scalar_lea.hbm %s1523_s3, 1792 }
  0x15   :  { %s51_s8 = sshll.u32 %s1392_s7, 4  ;;  %p1272_p8 = scmp.ne.s32.totalorder %s1523_s3, %s1271_s11  ;;  %s52_s8 = int_to_ptr.vmem [resolvable:$true] %s51_s8 }
  0x16   :  { %p1275_p9 = scmp.lt.u32.totalorder %s1271_s11, %s1523_s3 }
  0x18   :  { %p1277_p10 = pnand %p1275_p9, %p1272_p8 }
  0x1a   :  { %1280 = shalt.err (!%p1277_p10)
}
  0x1b   :  { %s1281_s16 = scalar_lea.vmem %s52_s8, 1792  ;;  %p1286_p12 = scmp.lt.s32.totalorder %s52_s8, %s52_s8 }
  0x1c   :  { %p1282_p11 = scmp.ne.s32.totalorder %s52_s8, %s1281_s16  ;;  %p1287_p13 = scmp.lt.s32.totalorder %s1281_s16, %s1281_s16 }
  0x1e   :  { %p1288_p0 = por %p1287_p13, %p1286_p12 }
  0x20   :  { %p1289_p1 = pnand %p1288_p0, %p1282_p11 }
  0x22   :  { %1292 = shalt.err (!%p1289_p1)
}
  0x23   :  { %s1393_s1 = smov 896   ;;  %s1394_s17 = smov 56  }
  0x24   :  { %57 = dma.hbm_to_vmem [thread:$0]  %s1523_s3, 1792, %s52_s8, [#allocation9], %s1393_s1, %s1393_s1, %s1394_s17  }
  0x25   :  { %s1395_s20 = smov [#allocation2]   ;;  %s1396_s22 = smov [#allocation7]  }
  0x26   :  { %s20_s21 = sshll.u32 %s1395_s20, 4  ;;  %s42_s23 = sshll.u32 %s1396_s22, 4  ;;  %s21_s21 = int_to_ptr.vmem [resolvable:$true] %s20_s21  ;;  %s43_s23 = int_to_ptr.vmem [resolvable:$true] %s42_s23 }
  0x27   :  { %s1293_s26 = scalar_lea.hbm %s1520_s0, 896 }
  0x28   :  { %p1294_p2 = scmp.ne.s32.totalorder %s1520_s0, %s1293_s26  ;;  %p1297_p3 = scmp.lt.u32.totalorder %s1293_s26, %s1520_s0 }
  0x2a   :  { %p1299_p4 = pnand %p1297_p3, %p1294_p2 }
  0x2c   :  { %1302 = shalt.err (!%p1299_p4)
}
  0x2d   :  { %s1303_s3 = scalar_lea.vmem %s21_s21, 896  ;;  %p1308_p6 = scmp.lt.s32.totalorder %s21_s21, %s21_s21 }
  0x2e   :  { %p1304_p5 = scmp.ne.s32.totalorder %s21_s21, %s1303_s3  ;;  %p1309_p7 = scmp.lt.s32.totalorder %s1303_s3, %s1303_s3 }
  0x30   :  { %p1310_p8 = por %p1309_p7, %p1308_p6 }
  0x32   :  { %p1311_p9 = pnand %p1310_p8, %p1304_p5 }
  0x34   :  { %1314 = shalt.err (!%p1311_p9)
}
  0x35   :  { %23 = dma.hbm_to_vmem [thread:$0]  %s1520_s0, 896, %s21_s21, [#allocation3]  }
  0x36   :  { %s1315_s10 = scalar_lea.hbm %s1522_s2, 16 }
  0x37   :  { %p1316_p10 = scmp.ne.s32.totalorder %s1522_s2, %s1315_s10  ;;  %p1319_p11 = scmp.lt.u32.totalorder %s1315_s10, %s1522_s2 }
  0x39   :  { %p1321_p12 = pnand %p1319_p11, %p1316_p10 }
  0x3b   :  { %1324 = shalt.err (!%p1321_p12)
}
  0x3c   :  { %s1325_s15 = scalar_lea.vmem %s43_s23, 16  ;;  %s1329_s16 = scalar_lea.vmem %s43_s23, 32 }
  0x3d   :  { %p1326_p13 = scmp.ne.s32.totalorder %s43_s23, %s1325_s15  ;;  %p1330_p0 = scmp.lt.s32.totalorder %s43_s23, %s43_s23 }
  0x3e   :  { %p1331_p1 = scmp.lt.s32.totalorder %s1329_s16, %s1325_s15 }
  0x40   :  { %p1332_p2 = por %p1331_p1, %p1330_p0 }
  0x42   :  { %p1333_p3 = pnand %p1332_p2, %p1326_p13 }
  0x44   :  { %1336 = shalt.err (!%p1333_p3)
}
  0x45   :  { %45 = dma.hbm_to_vmem [thread:$0]  %s1522_s2, 16, %s43_s23, [#allocation6]  }
  0x46   :  { %s1397_s17 = smov [#allocation10]   ;;  %s1337_s21 = scalar_lea.hbm %s1524_s4, 112 }
  0x47   :  { %s64_s18 = sshll.u32 %s1397_s17, 4  ;;  %p1338_p4 = scmp.ne.s32.totalorder %s1524_s4, %s1337_s21  ;;  %s65_s18 = int_to_ptr.vmem [resolvable:$true] %s64_s18 }
  0x48   :  { %p1341_p5 = scmp.lt.u32.totalorder %s1337_s21, %s1524_s4 }
  0x4a   :  { %p1343_p6 = pnand %p1341_p5, %p1338_p4 }
  0x4c   :  { %1346 = shalt.err (!%p1343_p6)
}
  0x4d   :  { %s1347_s27 = scalar_lea.vmem %s65_s18, 112  ;;  %s1351_s2 = scalar_lea.vmem %s65_s18, 128 }
  0x4e   :  { %p1348_p7 = scmp.ne.s32.totalorder %s65_s18, %s1347_s27  ;;  %p1352_p8 = scmp.lt.s32.totalorder %s65_s18, %s65_s18 }
  0x4f   :  { %p1353_p9 = scmp.lt.s32.totalorder %s1351_s2, %s1347_s27 }
  0x51   :  { %p1354_p10 = por %p1353_p9, %p1352_p8 }
  0x53   :  { %p1355_p11 = pnand %p1354_p10, %p1348_p7 }
  0x55   :  { %1358 = shalt.err (!%p1355_p11)
}
  0x56   :  { %67 = dma.hbm_to_vmem [thread:$0]  %s1524_s4, 112, %s65_s18, [#allocation9]  }
  0x57   :  { %1381 = dma.done.wait [#allocation3], 896  }
  0x58   :  { %1382 = vsyncadd [#allocation3], 4294966400 }
  0x59   :  { %1383 = dma.done.wait [#allocation6], 14352  }
  0x5a   :  { %1384 = vsyncadd [#allocation6], 4294952944 }
  0x5b   :  { %1385 = dma.done.wait [#allocation9], 1904  }
  0x5c   :  { %1386 = vsyncadd [#allocation9], 4294965392  ;;  %v106_v0 = vld [vmem:[#allocation5 + $0x80] sm:$0xff]  ;;  %v107_v1 = vld [vmem:[#allocation5 + $0x88] sm:$0xff]  ;;  %vm1399_vm0 = vmmov 0   ;;  %vm541_vm1 = vcmask 130048  }
  0x5d   :  { %v90_v2 = vld [vmem:[#allocation5] sm:$0xff]  ;;  %v1073_v3 = vpack.c.bf16 %v107_v1, %v106_v0  ;;  %v91_v4 = vld [vmem:[#allocation5 + $0x8] sm:$0xff]  ;;  %v108_v11 = vld [vmem:[#allocation5 + $0x90] sm:$0xff]  ;;  %s1401_s4 = smov [#allocation11]  }
  0x5e   :  { %v138_v5 = vld [vmem:[#allocation5 + $0x180] sm:$0xff]  ;;  %v139_v6 = vld [vmem:[#allocation5 + $0x188] sm:$0xff]  ;;  %v1075_v7 = vpack.c.bf16 %v91_v4, %v90_v2  ;;  %v109_v13 = vld [vmem:[#allocation5 + $0x98] sm:$0xff]  ;;  %s883_s29 = sshll.u32 %s1401_s4, 4  ;;  %s884_s29 = int_to_ptr.vmem [resolvable:$true] %s883_s29 }
  0x5f   :  { %v1105_v8 = vpack.c.bf16 %v139_v6, %v138_v5  ;;  %v122_v9 = vld [vmem:[#allocation5 + $0x100] sm:$0xff]  ;;  %v123_v10 = vld [vmem:[#allocation5 + $0x108] sm:$0xff]  ;;  %1074 = vmatprep.subr.bf16.mxu0 %v1073_v3  ;;  %v92_v14 = vld [vmem:[#allocation5 + $0x10] sm:$0xff]  ;;  %v1077_v16 = vpack.c.bf16 %v109_v13, %v108_v11  ;;  %s1359_s30 = scalar_lea.vmem %s884_s29, 896  ;;  %p1364_p13 = scmp.lt.s32.totalorder %s884_s29, %s884_s29 }
  0x60   :  { %v1107_v12 = vpack.c.bf16 %v123_v10, %v122_v9  ;;  %v93_v15 = vld [vmem:[#allocation5 + $0x18] sm:$0xff]  ;;  %1076 = vmatpush3.bf16.msra.mxu0 %v1075_v7  ;;  %v140_v18 = vld [vmem:[#allocation5 + $0x190] sm:$0xff]  ;;  %v110_v23 = vld [vmem:[#allocation5 + $0xa0] sm:$0xff]  ;;  %p1360_p12 = scmp.ne.s32.totalorder %s884_s29, %s1359_s30  ;;  %p1365_p0 = scmp.lt.s32.totalorder %s1359_s30, %s1359_s30 }
  0x61   :  { %1106 = vmatprep.subr.bf16.mxu1 %v1105_v8  ;;  %v1079_v17 = vpack.c.bf16 %v93_v15, %v92_v14  ;;  %v141_v19 = vld [vmem:[#allocation5 + $0x198] sm:$0xff]  ;;  %v124_v20 = vld [vmem:[#allocation5 + $0x110] sm:$0xff]  ;;  %v111_v24 = vld [vmem:[#allocation5 + $0xa8] sm:$0xff]  ;;  %1078 = vmatprep.subr.bf16.mxu0 %v1077_v16 }
  0x62   :  { %1108 = vmatpush3.bf16.msra.mxu1 %v1107_v12  ;;  %v1109_v21 = vpack.c.bf16 %v141_v19, %v140_v18  ;;  %v125_v22 = vld [vmem:[#allocation5 + $0x118] sm:$0xff]  ;;  %v1081_v26 = vpack.c.bf16 %v111_v24, %v110_v23  ;;  %v94_v27 = vld [vmem:[#allocation5 + $0x20] sm:$0xff]  ;;  %v95_v28 = vld [vmem:[#allocation5 + $0x28] sm:$0xff]  ;;  %p1366_p1 = por %p1365_p0, %p1364_p13 }
  0x63   :  { %v1111_v25 = vpack.c.bf16 %v125_v22, %v124_v20  ;;  %v142_v29 = vld [vmem:[#allocation5 + $0x1a0] sm:$0xff]  ;;  %v143_v30 = vld [vmem:[#allocation5 + $0x1a8] sm:$0xff]  ;;  %v1083_v33 = vpack.c.bf16 %v95_v28, %v94_v27  ;;  %v112_v35 = vld [vmem:[#allocation5 + $0xb0] sm:$0xff] }
  0x64   :  { %1110 = vmatprep.subr.bf16.mxu1 %v1109_v21  ;;  %v126_v31 = vld [vmem:[#allocation5 + $0x120] sm:$0xff]  ;;  %v127_v32 = vld [vmem:[#allocation5 + $0x128] sm:$0xff]  ;;  %1080 = vmatpush3.bf16.msra.mxu0 %v1079_v17  ;;  %v1113_v34 = vpack.c.bf16 %v143_v30, %v142_v29  ;;  %v113_v36 = vld [vmem:[#allocation5 + $0xb8] sm:$0xff]  ;;  %p1367_p2 = pnand %p1366_p1, %p1360_p12 }
  0x65   :  { %v96_v37 = vld [vmem:[#allocation5 + $0x30] sm:$0xff]  ;;  %1082 = vmatprep.subr.bf16.mxu0 %v1081_v26  ;;  %v1115_v38 = vpack.c.bf16 %v127_v32, %v126_v31  ;;  %v1085_v39 = vpack.c.bf16 %v113_v36, %v112_v35  ;;  %v97_v40 = vld [vmem:[#allocation5 + $0x38] sm:$0xff]  ;;  %v114_v46 = vld [vmem:[#allocation5 + $0xc0] sm:$0xff] }
  0x66   :  { %1112 = vmatpush3.bf16.msra.mxu1 %v1111_v25  ;;  %v144_v41 = vld [vmem:[#allocation5 + $0x1b0] sm:$0xff]  ;;  %v145_v42 = vld [vmem:[#allocation5 + $0x1b8] sm:$0xff]  ;;  %v115_v47 = vld [vmem:[#allocation5 + $0xc8] sm:$0xff]  ;;  %v1087_v48 = vpack.c.bf16 %v97_v40, %v96_v37 }
  0x67   :  { %1114 = vmatprep.subr.bf16.mxu1 %v1113_v34  ;;  %v1117_v43 = vpack.c.bf16 %v145_v42, %v144_v41  ;;  %v128_v44 = vld [vmem:[#allocation5 + $0x130] sm:$0xff]  ;;  %v129_v45 = vld [vmem:[#allocation5 + $0x138] sm:$0xff]  ;;  %v146_v49 = vld [vmem:[#allocation5 + $0x1c0] sm:$0xff]  ;;  %v1089_v52 = vpack.c.bf16 %v115_v47, %v114_v46 }
  0x68   :  { %1084 = vmatpush3.bf16.msra.mxu0 %v1083_v33  ;;  %v147_v50 = vld [vmem:[#allocation5 + $0x1c8] sm:$0xff]  ;;  %v1119_v51 = vpack.c.bf16 %v129_v45, %v128_v44  ;;  %v98_v53 = vld [vmem:[#allocation5 + $0x40] sm:$0xff]  ;;  %v116_v58 = vld [vmem:[#allocation5 + $0xd0] sm:$0xff] }
  0x69   :  { %1086 = vmatprep.subr.bf16.mxu0 %v1085_v39  ;;  %v99_v54 = vld [vmem:[#allocation5 + $0x48] sm:$0xff]  ;;  %v130_v55 = vld [vmem:[#allocation5 + $0x140] sm:$0xff]  ;;  %v1121_v56 = vpack.c.bf16 %v147_v50, %v146_v49  ;;  %v117_v59 = vld [vmem:[#allocation5 + $0xd8] sm:$0xff] }
  0x6a   :  { %1116 = vmatpush3.bf16.msra.mxu1 %v1115_v38  ;;  %v131_v57 = vld [vmem:[#allocation5 + $0x148] sm:$0xff]  ;;  %v148_v60 = vld [vmem:[#allocation5 + $0x1d0] sm:$0xff]  ;;  %v149_v61 = vld [vmem:[#allocation5 + $0x1d8] sm:$0xff]  ;;  %v1091_v62 = vpack.c.bf16 %v99_v54, %v98_v53  ;;  %v1093_v0 = vpack.c.bf16 %v117_v59, %v116_v58 }
  0x6b   :  { %1118 = vmatprep.subr.bf16.mxu1 %v1117_v43  ;;  %v1123_v63 = vpack.c.bf16 %v131_v57, %v130_v55  ;;  %v100_v1 = vld [vmem:[#allocation5 + $0x50] sm:$0xff]  ;;  %v101_v2 = vld [vmem:[#allocation5 + $0x58] sm:$0xff]  ;;  %v1125_v4 = vpack.c.bf16 %v149_v61, %v148_v60  ;;  %v118_v6 = vld [vmem:[#allocation5 + $0xe0] sm:$0xff] }
  0x6c   :  { %1088 = vmatpush3.bf16.msra.mxu0 %v1087_v48  ;;  %v132_v3 = vld [vmem:[#allocation5 + $0x150] sm:$0xff]  ;;  %v133_v5 = vld [vmem:[#allocation5 + $0x158] sm:$0xff]  ;;  %v119_v7 = vld [vmem:[#allocation5 + $0xe8] sm:$0xff]  ;;  %v1095_v10 = vpack.c.bf16 %v101_v2, %v100_v1  ;;  %v1400_v1 = vmov 0.0  }
  0x6d   :  { %1090 = vmatprep.subr.bf16.mxu0 %v1089_v52  ;;  %v150_v8 = vld [vmem:[#allocation5 + $0x1e0] sm:$0xff]  ;;  %v151_v9 = vld [vmem:[#allocation5 + $0x1e8] sm:$0xff]  ;;  %v84_v12 = vld [vmem:[#allocation2 + $0x8] sm:$0xff]  ;;  %v1127_v13 = vpack.c.bf16 %v133_v5, %v132_v3  ;;  %v1097_v14 = vpack.c.bf16 %v119_v7, %v118_v6 }
  0x6e   :  { %1120 = vmatpush3.bf16.msra.mxu1 %v1119_v51  ;;  %v102_v11 = vld [vmem:[#allocation5 + $0x60] sm:$0xff]  ;;  %v103_v15 = vld [vmem:[#allocation5 + $0x68] sm:$0xff]  ;;  %v1129_v18 = vpack.c.bf16 %v151_v9, %v150_v8  ;;  %v120_v19 = vld [vmem:[#allocation5 + $0xf0] sm:$0xff]  ;;  %273 = vmatprep.mubr.f32.mxu0 %v84_v12  ;;  %v1398_v51 = vmov 0.0|0.0  }
  0x6f   :  { %1122 = vmatprep.subr.bf16.mxu1 %v1121_v56  ;;  %v134_v16 = vld [vmem:[#allocation5 + $0x160] sm:$0xff]  ;;  %v135_v17 = vld [vmem:[#allocation5 + $0x168] sm:$0xff]  ;;  %v121_v20 = vld [vmem:[#allocation5 + $0xf8] sm:$0xff]  ;;  %v1099_v24 = vpack.c.bf16 %v103_v15, %v102_v11 }
  0x70   :  { %1092 = vmatpush3.bf16.msra.mxu0 %v1091_v62  ;;  %v86_v21 = vld [vmem:[#allocation2 + $0x18] sm:$0xff]  ;;  %v152_v22 = vld [vmem:[#allocation5 + $0x1f0] sm:$0xff]  ;;  %v153_v23 = vld [vmem:[#allocation5 + $0x1f8] sm:$0xff]  ;;  %v1131_v25 = vpack.c.bf16 %v135_v17, %v134_v16  ;;  %v1101_v26 = vpack.c.bf16 %v121_v20, %v120_v19 }
  0x71   :  { %1094 = vmatprep.subr.bf16.mxu0 %v1093_v0  ;;  %343 = vmatprep.mubr.f32.mxu1 %v86_v21  ;;  %v104_v27 = vld [vmem:[#allocation5 + $0x70] sm:$0xff]  ;;  %v105_v28 = vld [vmem:[#allocation5 + $0x78] sm:$0xff]  ;;  %v1133_v30 = vpack.c.bf16 %v153_v23, %v152_v22  ;;  %v170_v32 = vld [vmem:[#allocation5 + $0x280] sm:$0xff] }
  0x72   :  { %1124 = vmatpush3.bf16.msra.mxu1 %v1123_v63  ;;  %v136_v29 = vld [vmem:[#allocation5 + $0x170] sm:$0xff]  ;;  %v137_v31 = vld [vmem:[#allocation5 + $0x178] sm:$0xff]  ;;  %v171_v33 = vld [vmem:[#allocation5 + $0x288] sm:$0xff]  ;;  %v1103_v34 = vpack.c.bf16 %v105_v28, %v104_v27 }
  0x73   :  { %1126 = vmatprep.subr.bf16.mxu1 %v1125_v4  ;;  %v1135_v35 = vpack.c.bf16 %v137_v31, %v136_v29  ;;  %v1137_v36 = vpack.c.bf16 %v171_v33, %v170_v32  ;;  %v154_v37 = vld [vmem:[#allocation5 + $0x200] sm:$0xff]  ;;  %v155_v38 = vld [vmem:[#allocation5 + $0x208] sm:$0xff]  ;;  %v172_v39 = vld [vmem:[#allocation5 + $0x290] sm:$0xff] }
  0x74   :  { %1096 = vmatpush3.bf16.msra.mxu0 %v1095_v10  ;;  %v173_v40 = vld [vmem:[#allocation5 + $0x298] sm:$0xff]  ;;  %v186_v41 = vld [vmem:[#allocation5 + $0x300] sm:$0xff]  ;;  %v187_v42 = vld [vmem:[#allocation5 + $0x308] sm:$0xff]  ;;  %v1139_v44 = vpack.c.bf16 %v155_v38, %v154_v37 }
  0x75   :  { %1098 = vmatprep.subr.bf16.mxu0 %v1097_v14  ;;  %v83_v43 = vld [vmem:[#allocation2] sm:$0xff]  ;;  %v85_v45 = vld [vmem:[#allocation2 + $0x10] sm:$0xff]  ;;  %v1141_v46 = vpack.c.bf16 %v173_v40, %v172_v39  ;;  %v156_v47 = vld [vmem:[#allocation5 + $0x210] sm:$0xff]  ;;  %v1170_v49 = vpack.c.bf16 %v187_v42, %v186_v41 }
  0x76   :  { %1128 = vmatpush3.bf16.msra.mxu1 %v1127_v13  ;;  %v157_v48 = vld [vmem:[#allocation5 + $0x218] sm:$0xff]  ;;  %v174_v50 = vld [vmem:[#allocation5 + $0x2a0] sm:$0xff]  ;;  %v175_v52 = vld [vmem:[#allocation5 + $0x2a8] sm:$0xff] }
  0x77   :  { %1130 = vmatprep.subr.bf16.mxu1 %v1129_v18  ;;  %v188_v53 = vld [vmem:[#allocation5 + $0x310] sm:$0xff]  ;;  %v189_v54 = vld [vmem:[#allocation5 + $0x318] sm:$0xff]  ;;  %v1143_v55 = vpack.c.bf16 %v157_v48, %v156_v47  ;;  %v158_v56 = vld [vmem:[#allocation5 + $0x220] sm:$0xff]  ;;  %v1145_v57 = vpack.c.bf16 %v175_v52, %v174_v50 }
  0x78   :  { %1100 = vmatpush3.bf16.msra.mxu0 %v1099_v24  ;;  %v159_v58 = vld [vmem:[#allocation5 + $0x228] sm:$0xff]  ;;  %v1173_v59 = vpack.c.bf16 %v189_v54, %v188_v53  ;;  %v176_v60 = vld [vmem:[#allocation5 + $0x2b0] sm:$0xff]  ;;  %v177_v61 = vld [vmem:[#allocation5 + $0x2b8] sm:$0xff] }
  0x79   :  { %1102 = vmatprep.subr.bf16.mxu0 %v1101_v26  ;;  %v190_v62 = vld [vmem:[#allocation5 + $0x320] sm:$0xff]  ;;  %v191_v63 = vld [vmem:[#allocation5 + $0x328] sm:$0xff]  ;;  %v88_v0 = vld [vmem:[#allocation2 + $0x28] sm:$0xff]  ;;  %v1147_v2 = vpack.c.bf16 %v159_v58, %v158_v56  ;;  %v1149_v3 = vpack.c.bf16 %v177_v61, %v176_v60 }
  0x7a   :  { %1132 = vmatpush3.bf16.msra.mxu1 %v1131_v25  ;;  %v160_v4 = vld [vmem:[#allocation5 + $0x230] sm:$0xff]  ;;  %v161_v5 = vld [vmem:[#allocation5 + $0x238] sm:$0xff]  ;;  %v1176_v6 = vpack.c.bf16 %v191_v63, %v190_v62  ;;  %v178_v7 = vld [vmem:[#allocation5 + $0x2c0] sm:$0xff] }
  0x7b   :  { %1134 = vmatprep.subr.bf16.mxu1 %v1133_v30  ;;  %v179_v8 = vld [vmem:[#allocation5 + $0x2c8] sm:$0xff]  ;;  %v192_v9 = vld [vmem:[#allocation5 + $0x330] sm:$0xff]  ;;  %v193_v10 = vld [vmem:[#allocation5 + $0x338] sm:$0xff]  ;;  %v1151_v11 = vpack.c.bf16 %v161_v5, %v160_v4 }
  0x7c   :  { %1104 = vmatpush3.bf16.msra.mxu0 %v1103_v34  ;;  %v1153_v12 = vpack.c.bf16 %v179_v8, %v178_v7  ;;  %v162_v13 = vld [vmem:[#allocation5 + $0x240] sm:$0xff]  ;;  %v163_v14 = vld [vmem:[#allocation5 + $0x248] sm:$0xff]  ;;  %v1179_v15 = vpack.c.bf16 %v193_v10, %v192_v9  ;;  %v180_v16 = vld [vmem:[#allocation5 + $0x2d0] sm:$0xff] }
  0x7d   :  { %1138 = vmatprep.subr.bf16.mxu0 %v1137_v36  ;;  %v181_v17 = vld [vmem:[#allocation5 + $0x2d8] sm:$0xff]  ;;  %v194_v18 = vld [vmem:[#allocation5 + $0x340] sm:$0xff]  ;;  %v195_v19 = vld [vmem:[#allocation5 + $0x348] sm:$0xff]  ;;  %v1155_v20 = vpack.c.bf16 %v163_v14, %v162_v13 }
  0x7e   :  { %1136 = vmatpush3.bf16.msra.mxu1 %v1135_v35  ;;  %v1157_v21 = vpack.c.bf16 %v181_v17, %v180_v16  ;;  %v164_v22 = vld [vmem:[#allocation5 + $0x250] sm:$0xff]  ;;  %v165_v23 = vld [vmem:[#allocation5 + $0x258] sm:$0xff]  ;;  %v1182_v24 = vpack.c.bf16 %v195_v19, %v194_v18  ;;  %v182_v25 = vld [vmem:[#allocation5 + $0x2e0] sm:$0xff] }
  0x7f   :  { %1169 = vmatprep.subr.bf16.mxu1 %v1398_v51  ;;  %274 = vmatmul.mubr.f32.vlgmr.msra.gmra.mrb[0].mxu0 %v83_v43  ;;  %v183_v26 = vld [vmem:[#allocation5 + $0x2e8] sm:$0xff]  ;;  %v196_v27 = vld [vmem:[#allocation5 + $0x350] sm:$0xff]  ;;  %v197_v28 = vld [vmem:[#allocation5 + $0x358] sm:$0xff]  ;;  %v1159_v29 = vpack.c.bf16 %v165_v23, %v164_v22 }
  0x80   :  { %1140 = vmatpush3.bf16.msra.mxu0 %v1139_v44  ;;  %413 = vmatprep.mubr.f32.mxu0 %v88_v0  ;;  %v1161_v30 = vpack.c.bf16 %v183_v26, %v182_v25  ;;  %v166_v31 = vld [vmem:[#allocation5 + $0x260] sm:$0xff]  ;;  %v167_v32 = vld [vmem:[#allocation5 + $0x268] sm:$0xff]  ;;  %v1185_v33 = vpack.c.bf16 %v197_v28, %v196_v27  ;;  %v184_v34 = vld [vmem:[#allocation5 + $0x2f0] sm:$0xff] }
  0x81   :  { %344 = vmatmul.mubr.f32.vlgmr.msra.gmra.mrb[0].mxu1 %v85_v45  ;;  %1142 = vmatprep.subr.bf16.mxu0 %v1141_v46  ;;  %v185_v35 = vld [vmem:[#allocation5 + $0x2f8] sm:$0xff]  ;;  %v198_v36 = vld [vmem:[#allocation5 + $0x360] sm:$0xff]  ;;  %v199_v37 = vld [vmem:[#allocation5 + $0x368] sm:$0xff]  ;;  %v1163_v38 = vpack.c.bf16 %v167_v32, %v166_v31 }
  0x82   :  { %1171 = vmatpush3.bf16.msra.mxu1 %v1170_v49  ;;  %1063 = vmatprep.mubr.msk.f32.mxu1 %vm1399_vm0, %v1400_v1  ;;  %v1165_v39 = vpack.c.bf16 %v185_v35, %v184_v34  ;;  %v168_v40 = vld [vmem:[#allocation5 + $0x270] sm:$0xff]  ;;  %v169_v41 = vld [vmem:[#allocation5 + $0x278] sm:$0xff]  ;;  %v1188_v42 = vpack.c.bf16 %v199_v37, %v198_v36  ;;  %v87_v47 = vld [vmem:[#allocation2 + $0x20] sm:$0xff] }
  0x83   :  { %1172 = vmatprep.subr.bf16.mxu1 %v1398_v51  ;;  %v200_v43 = vld [vmem:[#allocation5 + $0x370] sm:$0xff]  ;;  %v201_v44 = vld [vmem:[#allocation5 + $0x378] sm:$0xff]  ;;  %v1167_v45 = vpack.c.bf16 %v169_v41, %v168_v40  ;;  %v498_v50 = vld [vmem:[#allocation8 + $0x40] sm:$0xff] }
  0x84   :  { %1144 = vmatpush3.bf16.msra.mxu0 %v1143_v55  ;;  %v1191_v46 = vpack.c.bf16 %v201_v44, %v200_v43  ;;  %v89_v48 = vld [vmem:[#allocation2 + $0x30] sm:$0xff]  ;;  %v491_v49 = vld [vmem:[#allocation8 + $0x8] sm:$0xff]  ;;  %v490_v54 = vld [vmem:[#allocation8] sm:$0xff] }
  0x85   :  { %1146 = vmatprep.subr.bf16.mxu0 %v1145_v57  ;;  %v493_v52 = vld [vmem:[#allocation8 + $0x18] sm:$0xff]  ;;  %v1193_v53 = vpack.c.bf16 %v498_v50, %v491_v49  ;;  %v500_v56 = vld [vmem:[#allocation8 + $0x50] sm:$0xff]  ;;  %v499_v60 = vld [vmem:[#allocation8 + $0x48] sm:$0xff] }
  0x86   :  { %1174 = vmatpush3.bf16.msra.mxu1 %v1173_v59  ;;  %v497_v55 = vld [vmem:[#allocation8 + $0x38] sm:$0xff]  ;;  %v1197_v58 = vpack.c.bf16 %v500_v56, %v493_v52  ;;  %v492_v59 = vld [vmem:[#allocation8 + $0x10] sm:$0xff]  ;;  %v495_v62 = vld [vmem:[#allocation8 + $0x28] sm:$0xff] }
  0x87   :  { %1175 = vmatprep.subr.bf16.mxu1 %v1398_v51  ;;  %v1195_v57 = vpack.c.bf16 %v497_v55, %v490_v54  ;;  %v1199_v61 = vpack.c.bf16 %v499_v60, %v492_v59  ;;  %v502_v63 = vld [vmem:[#allocation8 + $0x60] sm:$0xff]  ;;  %v501_v18 = vld [vmem:[#allocation8 + $0x58] sm:$0xff]  ;;  %v496_v19 = vld [vmem:[#allocation8 + $0x30] sm:$0xff] }
  0x88   :  { %1148 = vmatpush3.bf16.msra.mxu0 %v1147_v2  ;;  %v1201_v0 = vpack.c.bf16 %v502_v63, %v495_v62  ;;  %v494_v16 = vld [vmem:[#allocation8 + $0x20] sm:$0xff]  ;;  %v504_v28 = vld [vmem:[#allocation10] sm:$0xff] }
  0x89   :  { %1150 = vmatprep.subr.bf16.mxu0 %v1149_v3  ;;  %v894_v3 = vld [vmem:[#allocation7] ss:$0 sm:$0xff] }
  0x8a   :  { %1177 = vmatpush3.bf16.msra.mxu1 %v1176_v6 }
  0x8b   :  { %1178 = vmatprep.subr.bf16.mxu1 %v1398_v51 }
  0x8c   :  { %1152 = vmatpush3.bf16.msra.mxu0 %v1151_v11 }
  0x8d   :  { %1154 = vmatprep.subr.bf16.mxu0 %v1153_v12 }
  0x8e   :  { %1180 = vmatpush3.bf16.msra.mxu1 %v1179_v15 }
  0x8f   :  { %1181 = vmatprep.subr.bf16.mxu1 %v1398_v51 }
  0x90   :  { %1156 = vmatpush3.bf16.msra.mxu0 %v1155_v20 }
  0x91   :  { %1158 = vmatprep.subr.bf16.mxu0 %v1157_v21  ;;  %v1203_v21 = vpack.c.bf16 %v501_v18, %v494_v16 }
  0x92   :  { %1183 = vmatpush3.bf16.msra.mxu1 %v1182_v24  ;;  %v506_v24 = vlaneseq }
  0x93   :  { %1184 = vmatprep.subr.bf16.mxu1 %v1398_v51 }
  0x94   :  { %1160 = vmatpush3.bf16.msra.mxu0 %v1159_v29  ;;  %v507_v25 = vshrl.u32 %v506_v24, 7 }
  0x95   :  { %1162 = vmatprep.subr.bf16.mxu0 %v1161_v30 }
  0x96   :  { %1186 = vmatpush3.bf16.msra.mxu1 %v1185_v33  ;;  %v508_v26 = vsub.s32 0, %v507_v25  ;;  %v516_v27 = vsub.s32 2, %v507_v25  ;;  %v512_v29 = vsub.s32 1, %v507_v25  ;;  %v520_v30 = vsub.s32 3, %v507_v25 }
  0x97   :  { %1187 = vmatprep.subr.bf16.mxu1 %v1398_v51  ;;  %v524_v33 = vsub.s32 4, %v507_v25  ;;  %v532_v34 = vsub.s32 6, %v507_v25  ;;  %v528_v37 = vsub.s32 5, %v507_v25 }
  0x98   :  { %1164 = vmatpush3.bf16.msra.mxu0 %v1163_v38  ;;  %v509_v31 = vrot.slane %v504_v28, %v508_v26  ;;  %v517_v32 = vrot.slane %v504_v28, %v516_v27  ;;  %v513_v35 = vrot.slane %v504_v28, %v512_v29  ;;  %v521_v36 = vrot.slane %v504_v28, %v520_v30 }
  0x99   :  { %1166 = vmatprep.subr.bf16.mxu0 %v1165_v39  ;;  %v525_v43 = vrot.slane %v504_v28, %v524_v33  ;;  %v533_v44 = vrot.slane %v504_v28, %v532_v34 }
  0x9a   :  { %1189 = vmatpush3.bf16.msra.mxu1 %v1188_v42 }
  0x9b   :  { %1190 = vmatprep.subr.bf16.mxu1 %v1398_v51 }
  0x9c   :  { %1168 = vmatpush3.bf16.msra.mxu0 %v1167_v45 }
  0x9d   :  { %1194 = vmatprep.subr.bf16.mxu0 %v1193_v53 }
  0x9e   :  { %1192 = vmatpush3.bf16.msra.mxu1 %v1191_v46 }
  0x9f   :  { %414 = vmatmul.mubr.f32.vlgmr.msra.gmra.mrb[2].mxu0 %v87_v47  ;;  %1198 = vmatprep.subr.bf16.mxu1 %v1197_v58  ;;  %v529_v47 = vrot.slane %v504_v28, %v528_v37 }
  0xa0   :  { %609 = vmatprep.mubr.f32.mxu0 %v1400_v1  ;;  %1196 = vmatpush1.bf16.msra.mxu0 %v1195_v57 }
  0xa1   :  { %1064 = vmatmul.mubr.f32.vlgmr.msra.gmra.mrb[2].mxu1 %v89_v48  ;;  %1202 = vmatprep.subr.bf16.mxu0 %v1201_v0 }
  0xa2   :  { %680 = vmatprep.mubr.f32.mxu1 %v1400_v1  ;;  %1200 = vmatpush1.bf16.msra.mxu1 %v1199_v61 }
  0xa3   :  { %1205 = vmatprep.subr.bf16.mxu1 %v1398_v51  ;;  %v503_v51 = vld [vmem:[#allocation8 + $0x68] sm:$0xff] }
  0xa4   :  { %v1206_v22 = vpack.c.bf16 %v503_v51, %v496_v19 }
 0x152   :  { %v938_v2 = vpop.f32.mrb[0].mxu0 }
 0x153   :  { %v939_v4 = vpop.f32.mrb[1].mxu0 }
 0x154   :  { %v973_v5 = vpop.f32.mrb[0].mxu1  ;;  %v940_v6 = vadd.f32 %v939_v4, %v938_v2 }
 0x155   :  { %v974_v7 = vpop.f32.mrb[1].mxu1 }
 0x156   :  { %v975_v8 = vadd.f32 %v974_v7, %v973_v5  ;;  %v276_v9 = vadd.f32 %v940_v6, %v894_v3 }
 0x158   :  { %v346_v10 = vadd.f32 %v975_v8, %v276_v9 }
 0x172   :  { %v1008_v11 = vpop.f32.mrb[2].mxu0 }
 0x173   :  { %v1009_v12 = vpop.f32.mrb[3].mxu0 }
 0x174   :  { %v485_v13 = vpop.f32.mrb[2].mxu1  ;;  %v1010_v14 = vadd.f32 %v1009_v12, %v1008_v11 }
 0x175   :  { %v1065_v15 = vpop.f32.mrb[3].mxu1 }
 0x176   :  { %v416_v17 = vadd.f32 %v1010_v14, %v346_v10 }
 0x178   :  { %v486_v20 = vadd.f32 %v485_v13, %v416_v17 }
 0x17a   :  { %v489_v23 = vmax.f32 %v486_v20, 0.0 }
 0x17c   :  { %895 = vmatmul.mubr.msk.f32.vlgmr.msra.gmra.mrb[4].mxu0 %vm541_vm1, %v489_v23  ;;  %896 = vmatmul.mubr.msk.f32.vlgmr.msra.gmra.mrb[4].mxu1 %vm541_vm1, %v489_v23 }
 0x17d   :  { %1204 = vmatpush1.bf16.msra.mxu0 %v1203_v21  ;;  %1207 = vmatpush3.bf16.msra.mxu1 %v1206_v22 }
 0x17e   :  { %751 = vmatprep.mubr.f32.mxu0 %v1400_v1  ;;  %1070 = vmatprep.mubr.msk.f32.mxu1 %vm1399_vm0, %v1400_v1 }
 0x180   :  { %897 = vmatmul.mubr.msk.f32.vlgmr.msra.gmra.mrb[6].mxu0 %vm541_vm1, %v489_v23  ;;  %1071 = vmatmul.mubr.msk.f32.vlgmr.msra.gmra.mrb[6].mxu1 %vm541_vm1, %v489_v23 }
 0x24f   :  { %v611_v38 = vpop.f32.mrb[4].mxu0  ;;  %v682_v39 = vpop.f32.mrb[4].mxu1 }
 0x250   :  { %v612_v40 = vadd.f32 %v611_v38, %v509_v31  ;;  %v683_v1 = vadd.f32 %v682_v39, %v517_v32  ;;  %v613_v41 = vpop.f32.mrb[5].mxu0  ;;  %v684_v42 = vpop.f32.mrb[5].mxu1 }
 0x251   :  { %v614_v45 = vadd.f32 %v613_v41, %v513_v35  ;;  %v685_v46 = vadd.f32 %v684_v42, %v521_v36 }
 0x252   :  { %v899_v48 = vmul.f32 -1.442695, %v612_v40  ;;  %v901_v49 = vmul.f32 -1.442695, %v683_v1 }
 0x253   :  { %v900_v50 = vmul.f32 -1.442695, %v614_v45  ;;  %v902_v52 = vmul.f32 -1.442695, %v685_v46  ;;  %v753_v53 = vpop.f32.mrb[6].mxu0  ;;  %v824_v54 = vpop.f32.mrb[6].mxu1 }
 0x254   :  { %1221 = vpow2.f32 %v899_v48  ;;  %v754_v55 = vadd.f32 %v753_v53, %v525_v43  ;;  %v825_v56 = vadd.f32 %v824_v54, %v533_v44  ;;  %v755_v57 = vpop.f32.mrb[7].mxu0  ;;  %v1072_v58 = vpop.f32.mrb[7].mxu1 }
 0x255   :  { %1223 = vpow2.f32 %v901_v49  ;;  %v756_v59 = vadd.f32 %v755_v57, %v529_v47 }
 0x256   :  { %1225 = vpow2.f32 %v900_v50  ;;  %v903_v60 = vmul.f32 -1.442695, %v754_v55  ;;  %v905_v61 = vmul.f32 -1.442695, %v825_v56 }
 0x257   :  { %1227 = vpow2.f32 %v902_v52  ;;  %v904_v62 = vmul.f32 -1.442695, %v756_v59 }
 0x258   :  { %1229 = vpow2.f32 %v903_v60 }
 0x259   :  { %1231 = vpow2.f32 %v905_v61 }
 0x25a   :  { %1233 = vpow2.f32 %v904_v62 }
 0x25e   :  { %v1222_v63 = vpop.eup %1221 }
 0x25f   :  { %v1224_v0 = vpop.eup %1223  ;;  %v849_v2 = vadd.f32 1.0, %v1222_v63 }
 0x260   :  { %v1226_v3 = vpop.eup %1225  ;;  %v851_v4 = vadd.f32 1.0, %v1224_v0 }
 0x261   :  { %v1228_v5 = vpop.eup %1227  ;;  %1235 = vrcp.f32 %v849_v2  ;;  %v850_v6 = vadd.f32 1.0, %v1226_v3 }
 0x262   :  { %v1230_v7 = vpop.eup %1229  ;;  %1237 = vrcp.f32 %v851_v4  ;;  %v852_v8 = vadd.f32 1.0, %v1228_v5 }
 0x263   :  { %v1232_v9 = vpop.eup %1231  ;;  %1239 = vrcp.f32 %v850_v6  ;;  %v853_v10 = vadd.f32 1.0, %v1230_v7 }
 0x264   :  { %v1234_v11 = vpop.eup %1233  ;;  %1241 = vrcp.f32 %v852_v8  ;;  %v855_v12 = vadd.f32 1.0, %v1232_v9 }
 0x265   :  { %1243 = vrcp.f32 %v853_v10  ;;  %v854_v13 = vadd.f32 1.0, %v1234_v11 }
 0x266   :  { %1245 = vrcp.f32 %v855_v12 }
 0x267   :  { %1247 = vrcp.f32 %v854_v13 }
 0x26b   :  { %v1236_v14 = vpop.eup %1235 }
 0x26c   :  { %v1238_v15 = vpop.eup %1237  ;;  %870 = vst [vmem:[#allocation11] sm:$0xff] %v1236_v14 }
 0x26d   :  { %v1240_v16 = vpop.eup %1239  ;;  %872 = vst [vmem:[#allocation11 + $0x10] sm:$0xff] %v1238_v15 }
 0x26e   :  { %v1242_v17 = vpop.eup %1241  ;;  %871 = vst [vmem:[#allocation11 + $0x8] sm:$0xff] %v1240_v16 }
 0x26f   :  { %v1244_v18 = vpop.eup %1243  ;;  %873 = vst [vmem:[#allocation11 + $0x18] sm:$0xff] %v1242_v17 }
 0x270   :  { %v1246_v19 = vpop.eup %1245  ;;  %874 = vst [vmem:[#allocation11 + $0x20] sm:$0xff] %v1244_v18 }
 0x271   :  { %v1248_v51 = vpop.eup %1247  ;;  %876 = vst [vmem:[#allocation11 + $0x30] sm:$0xff] %v1246_v19 }
 0x272   :  { %875 = vst [vmem:[#allocation11 + $0x28] sm:$0xff] %v1248_v51 }
 0x273   :  { %1370 = shalt.err (!%p1367_p2)
}
 0x274   :  { %s1371_s7 = scalar_lea.hbm %s1525_s5, 896 }
 0x275   :  { %p1372_p3 = scmp.ne.s32.totalorder %s1525_s5, %s1371_s7  ;;  %p1375_p4 = scmp.lt.u32.totalorder %s1371_s7, %s1525_s5 }
 0x277   :  { %p1377_p5 = pnand %p1375_p4, %p1372_p3 }
 0x279   :  { %1380 = shalt.err (!%p1377_p5)
}
 0x27a   :  { %886 = dma.vmem_to_hbm [thread:$0]  %s884_s29, 896, %s1525_s5, [#allocation4]  }
 0x27b   :  { %1387 = dma.done.wait [#allocation4], 896  }
 0x27c   :  { %1388 = vsyncadd [#allocation4], 4294966400 }
 0x27d   :  { %890 = vsyncpa [#allocation3], 1 }
 0x27e   :  { %891 = vsyncpa [#allocation6], 1 }
 0x27f   :  { %892 = vsyncpa [#allocation9], 1 }
 0x280   :  { %893 = vsyncpa [#allocation4], 1 }

</bundles_post_ra>
